<compile_context>
chip_gen: v7x
topology: tpu7x:2x2x1
jax: 0.10.0
libtpu: 0.0.40
codegen_flags: <defaults>
</compile_context>

<pallas_src>
import jax
import jax.numpy as jnp
from jax.experimental import pallas as pl
from jax.experimental.pallas import tpu as pltpu

# ---------------- model hyper-params (small, consistent with the module) ----
B = 2          # batch
T = 8          # sequence length
E = 32         # num_embed
H = 4          # num_head
HS = E // H    # head_size
FF = 4 * E     # feed-forward hidden size
LN_EPS = 1e-5


def _layernorm(z, gamma, beta):
    mu = jnp.mean(z, axis=-1, keepdims=True)
    var = jnp.mean((z - mu) ** 2, axis=-1, keepdims=True)
    return (z - mu) * jax.lax.rsqrt(var + LN_EPS) * gamma + beta


def block_kernel(x_ref, wqkv_ref, wo3_ref, w1_ref, w2_ref, vec_ref, o_ref):
    # One batch element per grid step (grid=(B,), "parallel" -> megacore on v7x).
    x = x_ref[...]                                   # (T, E) f32
    xb = x.astype(jnp.bfloat16)
    # Hoisted once, reused by the three head-batched projections
    # (JAX does not CSE broadcast_in_dim, so build it a single time).
    xh = jnp.broadcast_to(xb[None, :, :], (H, T, E))  # (H, T, E) bf16

    # ---- head-batched Q/K/V projections (no in-kernel slicing / stacking) ----
    # wqkv_ref is (3, H, E, HS); leading-axis indexing is pure addressing.
    qh = jnp.einsum('hte,hed->htd', xh, wqkv_ref[0],
                    preferred_element_type=jnp.float32).astype(jnp.bfloat16)
    kh = jnp.einsum('hte,hed->htd', xh, wqkv_ref[1],
                    preferred_element_type=jnp.float32).astype(jnp.bfloat16)
    vh = jnp.einsum('hte,hed->htd', xh, wqkv_ref[2],
                    preferred_element_type=jnp.float32).astype(jnp.bfloat16)

    # ---- scores + causal mask (per batch element -> plain (T, T) causal) -----
    s = jnp.einsum('hqd,hkd->hqk', qh, kh,
                   preferred_element_type=jnp.float32) * (1.0 / HS ** 0.5)

    row = jax.lax.broadcasted_iota(jnp.int32, (T, T), 0)
    col = jax.lax.broadcasted_iota(jnp.int32, (T, T), 1)
    mask = row >= col
    s = jnp.where(mask[None, :, :], s, -1e30)        # finite fill (NaN-safe)

    # softmax: exp + approximate reciprocal both run on the otherwise-idle EUP
    m = jnp.max(s, axis=-1, keepdims=True)
    e = jnp.exp(s - m)
    p = e * pl.reciprocal(jnp.sum(e, axis=-1, keepdims=True), approx=True)

    att3 = jnp.einsum('hqk,hkd->hqd', p.astype(jnp.bfloat16), vh,
                      preferred_element_type=jnp.float32)    # (H, T, HS) f32

    # ---- packed small vectors (one (8, FF) f32 tile) -------------------------
    bo = vec_ref[0:1, :E]
    g1 = vec_ref[1:2, :E]
    be1 = vec_ref[2:3, :E]
    bf1 = vec_ref[3:4, :]
    bf2 = vec_ref[4:5, :E]
    g2 = vec_ref[5:6, :E]
    be2 = vec_ref[6:7, :E]

    # ---- output projection without a head-concat -----------------------------
    # y = att @ Wo  ==  sum_h att3[h] @ Wo3[h]   (Wo3 reshaped host-side)
    yh = jnp.einsum('htd,hde->hte', att3.astype(jnp.bfloat16), wo3_ref[...],
                    preferred_element_type=jnp.float32)      # (H, T, E) f32
    y = jnp.sum(yh, axis=0) + bo
    # TODO(synk): the torch forward does `print(y)` (host side-effect) — omitted.

    # ---- residual + LayerNorm1 ----------------------------------------------
    x1 = _layernorm(x + y, g1, be1)

    # ---- feed-forward: Linear(E,4E) -> ReLU -> Linear(4E,E) ------------------
    h1 = jnp.dot(x1.astype(jnp.bfloat16), w1_ref[...],
                 preferred_element_type=jnp.float32) + bf1
    h1 = jnp.maximum(h1, 0.0)
    y2 = jnp.dot(h1.astype(jnp.bfloat16), w2_ref[...],
                 preferred_element_type=jnp.float32) + bf2

    # ---- residual + LayerNorm2 ----------------------------------------------
    o_ref[...] = _layernorm(x1 + y2, g2, be2)


def block_forward(x, params):
    (wq, wk, wv, wo, bo, g1, be1, w1, bf1, w2, bf2, g2, be2) = params

    # ---- host-side (free) layout plumbing ------------------------------------
    # Head-major projection weights: head h uses columns h*HS:(h+1)*HS.
    def to_heads(w):                                  # (E, E) -> (H, E, HS)
        return w.reshape(E, H, HS).transpose(1, 0, 2)

    wqkv3 = jnp.stack([to_heads(wq), to_heads(wk), to_heads(wv)],
                      axis=0).astype(jnp.bfloat16)    # (3, H, E, HS)
    wo3 = wo.reshape(H, HS, E).astype(jnp.bfloat16)   # rows h*HS:(h+1)*HS -> head h
    w1_b = w1.astype(jnp.bfloat16)
    w2_b = w2.astype(jnp.bfloat16)

    # Pack the seven small bias / LayerNorm vectors into one (8, FF) f32 tile.
    vecs = jnp.zeros((8, FF), jnp.float32)
    vecs = vecs.at[0, :E].set(bo[0])
    vecs = vecs.at[1, :E].set(g1[0])
    vecs = vecs.at[2, :E].set(be1[0])
    vecs = vecs.at[3, :].set(bf1[0])
    vecs = vecs.at[4, :E].set(bf2[0])
    vecs = vecs.at[5, :E].set(g2[0])
    vecs = vecs.at[6, :E].set(be2[0])

    flops = B * (2 * T * E * 3 * E            # Q/K/V projections
                 + 2 * 2 * H * T * T * HS     # scores + weighted sum
                 + 2 * T * E * E              # output projection
                 + 2 * 2 * T * E * FF)        # feed-forward
    cost = pl.CostEstimate(
        flops=flops,
        transcendentals=B * (H * T * T + H * T + 2 * T),
        bytes_accessed=(2 * B * T * E * 4                      # x in + out (f32)
                        + 2 * (3 * E * E + E * E + 2 * E * FF)  # bf16 weights
                        + 8 * FF * 4),                          # packed vectors
    )

    out = pl.pallas_call(
        block_kernel,
        out_shape=jax.ShapeDtypeStruct((B, T, E), jnp.float32),
        grid=(B,),                                    # one batch element per core
        in_specs=[
            pl.BlockSpec((None, T, E), lambda b: (b, 0, 0)),        # x[b]
            pl.BlockSpec((3, H, E, HS), lambda b: (0, 0, 0, 0)),    # Wq/Wk/Wv (bf16)
            pl.BlockSpec((H, HS, E), lambda b: (0, 0, 0)),          # Wo (bf16)
            pl.BlockSpec((E, FF), lambda b: (0, 0)),                # FF W1 (bf16)
            pl.BlockSpec((FF, E), lambda b: (0, 0)),                # FF W2 (bf16)
            pl.BlockSpec((8, FF), lambda b: (0, 0)),                # packed vectors
        ],
        out_specs=pl.BlockSpec((None, T, E), lambda b: (b, 0, 0)),
        compiler_params=pltpu.CompilerParams(
            dimension_semantics=("parallel",)),       # 2 TCs on v7x; cheap loop elsewhere
        cost_estimate=cost,
    )(x, wqkv3, wo3, w1_b, w2_b, vecs)
    return out


def block_reference(x, params):
    """Pure-JAX f32 reference mirroring the PyTorch forward."""
    (wq, wk, wv, wo, bo, g1, be1, w1, bf1, w2, bf2, g2, be2) = params
    q = x @ wq
    k = x @ wk
    v = x @ wv
    qh = q.reshape(B, T, H, HS).transpose(0, 2, 1, 3)
    kh = k.reshape(B, T, H, HS).transpose(0, 2, 1, 3)
    vh = v.reshape(B, T, H, HS).transpose(0, 2, 1, 3)
    s = jnp.einsum("bhqd,bhkd->bhqk", qh, kh) / (HS ** 0.5)
    mask = jnp.tril(jnp.ones((T, T), bool))
    s = jnp.where(mask, s, -jnp.inf)
    p = jax.nn.softmax(s, axis=-1)
    att = jnp.einsum("bhqk,bhkd->bhqd", p, vh).transpose(0, 2, 1, 3).reshape(B, T, E)
    y = att @ wo + bo
    x1 = _layernorm(x + y, g1, be1)
    h1 = jnp.maximum(x1 @ w1 + bf1, 0.0)
    y2 = h1 @ w2 + bf2
    return _layernorm(x1 + y2, g2, be2)


def init_params(key):
    ks = jax.random.split(key, 8)
    s = 0.02
    wq = jax.random.normal(ks[0], (E, E), jnp.float32) * s
    wk = jax.random.normal(ks[1], (E, E), jnp.float32) * s
    wv = jax.random.normal(ks[2], (E, E), jnp.float32) * s
    wo = jax.random.normal(ks[3], (E, E), jnp.float32) * s
    bo = jax.random.normal(ks[4], (1, E), jnp.float32) * s
    w1 = jax.random.normal(ks[5], (E, FF), jnp.float32) * s
    bf1 = jax.random.normal(ks[6], (1, FF), jnp.float32) * s
    w2 = jax.random.normal(ks[7], (FF, E), jnp.float32) * s
    bf2 = jnp.zeros((1, E), jnp.float32)
    # LayerNorm params initialized like torch: ones / zeros
    g1 = jnp.ones((1, E), jnp.float32)
    be1 = jnp.zeros((1, E), jnp.float32)
    g2 = jnp.ones((1, E), jnp.float32)
    be2 = jnp.zeros((1, E), jnp.float32)
    return (wq, wk, wv, wo, bo, g1, be1, w1, bf1, w2, bf2, g2, be2)


if __name__ == "__main__":
    key = jax.random.PRNGKey(0)
    kx, kp = jax.random.split(key)
    x = jax.random.normal(kx, (B, T, E), jnp.float32)
    params = init_params(kp)

    out = block_forward(x, params)
    out = jax.block_until_ready(out)

    ref = block_reference(x, params)
    assert out.shape == (B, T, E)
    # bf16 MXU inputs + approx reciprocal => compare with relaxed tolerance
    assert jnp.allclose(out, ref, atol=2e-2, rtol=2e-2), "mismatch vs reference"
    print("KERNEL_OK")
</pallas_src>

<mosaic_0001>
module attributes {stable_mosaic.version = 11 : i64} {
  func.func @block_kernel(%arg0: i32, %arg1: memref<1x8x32xf32, #tpu.memory_space<vmem>>, %arg2: memref<3x4x32x8xbf16, #tpu.memory_space<vmem>>, %arg3: memref<4x8x32xbf16, #tpu.memory_space<vmem>>, %arg4: memref<32x128xbf16, #tpu.memory_space<vmem>>, %arg5: memref<128x32xbf16, #tpu.memory_space<vmem>>, %arg6: memref<8x128xf32, #tpu.memory_space<vmem>>, %arg7: memref<1x8x32xf32, #tpu.memory_space<vmem>>) attributes {dimension_semantics = [#tpu.dimension_semantics<parallel>], iteration_bounds = array<i64: 2>, scalar_prefetch = 0 : i64, scratch_operands = 0 : i64, tpu.core_type = #tpu.core_type<tc>, window_params = [{transform_indices = @transform_0, window_bounds = array<i64: 1, 8, 32>}, {pipeline_mode = #tpu.pipeline_mode<synchronous>, transform_indices = @transform_1, window_bounds = array<i64: 3, 4, 32, 8>}, {pipeline_mode = #tpu.pipeline_mode<synchronous>, transform_indices = @transform_2, window_bounds = array<i64: 4, 8, 32>}, {pipeline_mode = #tpu.pipeline_mode<synchronous>, transform_indices = @transform_3, window_bounds = array<i64: 32, 128>}, {pipeline_mode = #tpu.pipeline_mode<synchronous>, transform_indices = @transform_4, window_bounds = array<i64: 128, 32>}, {pipeline_mode = #tpu.pipeline_mode<synchronous>, transform_indices = @transform_5, window_bounds = array<i64: 8, 128>}, {transform_indices = @transform_6, window_bounds = array<i64: 1, 8, 32>}]} {
    %c0 = arith.constant 0 : index
    %c0_0 = arith.constant 0 : index
    %c0_1 = arith.constant 0 : index
    %0 = vector.load %arg1[%c0, %c0_0, %c0_1] : memref<1x8x32xf32, #tpu.memory_space<vmem>>, vector<1x8x32xf32>
    %1 = vector.shape_cast %0 : vector<1x8x32xf32> to vector<8x32xf32>
    %2 = arith.truncf %1 : vector<8x32xf32> to vector<8x32xbf16>
    %3 = vector.shape_cast %2 : vector<8x32xbf16> to vector<1x8x32xbf16>
    %4 = vector.shape_cast %3 : vector<1x8x32xbf16> to vector<1x8x32xbf16>
    %5 = vector.broadcast %4 : vector<1x8x32xbf16> to vector<4x8x32xbf16>
    %c0_2 = arith.constant 0 : index
    %c0_3 = arith.constant 0 : index
    %c0_4 = arith.constant 0 : index
    %c0_5 = arith.constant 0 : index
    %6 = vector.load %arg2[%c0_2, %c0_3, %c0_4, %c0_5] : memref<3x4x32x8xbf16, #tpu.memory_space<vmem>>, vector<1x4x32x8xbf16>
    %7 = vector.shape_cast %6 : vector<1x4x32x8xbf16> to vector<4x32x8xbf16>
    "tpu.trace_start"() <{level = 10 : i32, message = "hte,hed->htd"}> : () -> ()
    %cst = arith.constant dense<0.000000e+00> : vector<4x8x8xf32>
    %8 = tpu.matmul %5, %7, %cst {dimension_numbers = #tpu.dot_dimension_numbers<[2], [1], [1], [2], [0, 0, 0, 1, 1, 2], [0], [0]>} : vector<4x8x32xbf16>, vector<4x32x8xbf16>, vector<4x8x8xf32> -> vector<4x8x8xf32>
    "tpu.trace_stop"() : () -> ()
    %9 = arith.truncf %8 : vector<4x8x8xf32> to vector<4x8x8xbf16>
    %c1 = arith.constant 1 : index
    %c0_6 = arith.constant 0 : index
    %c0_7 = arith.constant 0 : index
    %c0_8 = arith.constant 0 : index
    %10 = vector.load %arg2[%c1, %c0_6, %c0_7, %c0_8] : memref<3x4x32x8xbf16, #tpu.memory_space<vmem>>, vector<1x4x32x8xbf16>
    %11 = vector.shape_cast %10 : vector<1x4x32x8xbf16> to vector<4x32x8xbf16>
    "tpu.trace_start"() <{level = 10 : i32, message = "hte,hed->htd"}> : () -> ()
    %cst_9 = arith.constant dense<0.000000e+00> : vector<4x8x8xf32>
    %12 = tpu.matmul %5, %11, %cst_9 {dimension_numbers = #tpu.dot_dimension_numbers<[2], [1], [1], [2], [0, 0, 0, 1, 1, 2], [0], [0]>} : vector<4x8x32xbf16>, vector<4x32x8xbf16>, vector<4x8x8xf32> -> vector<4x8x8xf32>
    "tpu.trace_stop"() : () -> ()
    %13 = arith.truncf %12 : vector<4x8x8xf32> to vector<4x8x8xbf16>
    %c2 = arith.constant 2 : index
    %c0_10 = arith.constant 0 : index
    %c0_11 = arith.constant 0 : index
    %c0_12 = arith.constant 0 : index
    %14 = vector.load %arg2[%c2, %c0_10, %c0_11, %c0_12] : memref<3x4x32x8xbf16, #tpu.memory_space<vmem>>, vector<1x4x32x8xbf16>
    %15 = vector.shape_cast %14 : vector<1x4x32x8xbf16> to vector<4x32x8xbf16>
    "tpu.trace_start"() <{level = 10 : i32, message = "hte,hed->htd"}> : () -> ()
    %cst_13 = arith.constant dense<0.000000e+00> : vector<4x8x8xf32>
    %16 = tpu.matmul %5, %15, %cst_13 {dimension_numbers = #tpu.dot_dimension_numbers<[2], [1], [1], [2], [0, 0, 0, 1, 1, 2], [0], [0]>} : vector<4x8x32xbf16>, vector<4x32x8xbf16>, vector<4x8x8xf32> -> vector<4x8x8xf32>
    "tpu.trace_stop"() : () -> ()
    %17 = arith.truncf %16 : vector<4x8x8xf32> to vector<4x8x8xbf16>
    "tpu.trace_start"() <{level = 10 : i32, message = "hqd,hkd->hqk"}> : () -> ()
    %cst_14 = arith.constant dense<0.000000e+00> : vector<4x8x8xf32>
    %18 = tpu.matmul %9, %13, %cst_14 {dimension_numbers = #tpu.dot_dimension_numbers<[2], [2], [1], [1], [0, 0, 0, 1, 1, 1], [0], [0]>} : vector<4x8x8xbf16>, vector<4x8x8xbf16>, vector<4x8x8xf32> -> vector<4x8x8xf32>
    "tpu.trace_stop"() : () -> ()
    %cst_15 = arith.constant 0.353553385 : f32
    %19 = vector.broadcast %cst_15 : f32 to vector<4x8x8xf32>
    %20 = arith.mulf %18, %19 : vector<4x8x8xf32>
    %21 = tpu.iota {dimensions = array<i32: 0>} : vector<8x8xi32>
    %22 = tpu.iota {dimensions = array<i32: 1>} : vector<8x8xi32>
    %23 = arith.cmpi sge, %21, %22 : vector<8x8xi32>
    %24 = vector.shape_cast %23 : vector<8x8xi1> to vector<1x8x8xi1>
    %cst_16 = arith.constant -1.000000e+30 : f32
    %25 = vector.shape_cast %24 : vector<1x8x8xi1> to vector<1x8x8xi1>
    %26 = vector.broadcast %25 : vector<1x8x8xi1> to vector<4x8x8xi1>
    %27 = vector.broadcast %cst_16 : f32 to vector<4x8x8xf32>
    %28 = arith.select %26, %20, %27 : vector<4x8x8xi1>, vector<4x8x8xf32>
    %cst_17 = arith.constant dense<0xFF800000> : vector<4x8xf32>
    %29 = vector.multi_reduction <maximumf>, %28, %cst_17 [2] : vector<4x8x8xf32> to vector<4x8xf32>
    %30 = vector.shape_cast %29 : vector<4x8xf32> to vector<4x8x1xf32>
    %31 = vector.broadcast %30 : vector<4x8x1xf32> to vector<4x8x8xf32>
    %32 = arith.subf %28, %31 : vector<4x8x8xf32>
    %33 = math.exp %32 : vector<4x8x8xf32>
    %cst_18 = arith.constant dense<0.000000e+00> : vector<4x8xf32>
    %34 = vector.multi_reduction <add>, %33, %cst_18 [2] : vector<4x8x8xf32> to vector<4x8xf32>
    %35 = vector.shape_cast %34 : vector<4x8xf32> to vector<4x8x1xf32>
    %36 = tpu.reciprocal %35 {approx = true} : vector<4x8x1xf32> -> vector<4x8x1xf32>
    %37 = vector.broadcast %36 : vector<4x8x1xf32> to vector<4x8x8xf32>
    %38 = arith.mulf %33, %37 : vector<4x8x8xf32>
    %39 = arith.truncf %38 : vector<4x8x8xf32> to vector<4x8x8xbf16>
    "tpu.trace_start"() <{level = 10 : i32, message = "hqk,hkd->hqd"}> : () -> ()
    %cst_19 = arith.constant dense<0.000000e+00> : vector<4x8x8xf32>
    %40 = tpu.matmul %39, %17, %cst_19 {dimension_numbers = #tpu.dot_dimension_numbers<[2], [1], [1], [2], [0, 0, 0, 1, 1, 2], [0], [0]>} : vector<4x8x8xbf16>, vector<4x8x8xbf16>, vector<4x8x8xf32> -> vector<4x8x8xf32>
    "tpu.trace_stop"() : () -> ()
    %c0_20 = arith.constant 0 : index
    %c0_21 = arith.constant 0 : index
    %41 = vector.load %arg6[%c0_20, %c0_21] : memref<8x128xf32, #tpu.memory_space<vmem>>, vector<1x32xf32>
    %c1_22 = arith.constant 1 : index
    %c0_23 = arith.constant 0 : index
    %42 = vector.load %arg6[%c1_22, %c0_23] : memref<8x128xf32, #tpu.memory_space<vmem>>, vector<1x32xf32>
    %c2_24 = arith.constant 2 : index
    %c0_25 = arith.constant 0 : index
    %43 = vector.load %arg6[%c2_24, %c0_25] : memref<8x128xf32, #tpu.memory_space<vmem>>, vector<1x32xf32>
    %c3 = arith.constant 3 : index
    %c0_26 = arith.constant 0 : index
    %44 = vector.load %arg6[%c3, %c0_26] : memref<8x128xf32, #tpu.memory_space<vmem>>, vector<1x128xf32>
    %c4 = arith.constant 4 : index
    %c0_27 = arith.constant 0 : index
    %45 = vector.load %arg6[%c4, %c0_27] : memref<8x128xf32, #tpu.memory_space<vmem>>, vector<1x32xf32>
    %c5 = arith.constant 5 : index
    %c0_28 = arith.constant 0 : index
    %46 = vector.load %arg6[%c5, %c0_28] : memref<8x128xf32, #tpu.memory_space<vmem>>, vector<1x32xf32>
    %c6 = arith.constant 6 : index
    %c0_29 = arith.constant 0 : index
    %47 = vector.load %arg6[%c6, %c0_29] : memref<8x128xf32, #tpu.memory_space<vmem>>, vector<1x32xf32>
    %48 = arith.truncf %40 : vector<4x8x8xf32> to vector<4x8x8xbf16>
    %c0_30 = arith.constant 0 : index
    %c0_31 = arith.constant 0 : index
    %c0_32 = arith.constant 0 : index
    %49 = vector.load %arg3[%c0_30, %c0_31, %c0_32] : memref<4x8x32xbf16, #tpu.memory_space<vmem>>, vector<4x8x32xbf16>
    "tpu.trace_start"() <{level = 10 : i32, message = "htd,hde->hte"}> : () -> ()
    %cst_33 = arith.constant dense<0.000000e+00> : vector<4x8x32xf32>
    %50 = tpu.matmul %48, %49, %cst_33 {dimension_numbers = #tpu.dot_dimension_numbers<[2], [1], [1], [2], [0, 0, 0, 1, 1, 2], [0], [0]>} : vector<4x8x8xbf16>, vector<4x8x32xbf16>, vector<4x8x32xf32> -> vector<4x8x32xf32>
    "tpu.trace_stop"() : () -> ()
    %cst_34 = arith.constant dense<0.000000e+00> : vector<8x32xf32>
    %51 = vector.multi_reduction <add>, %50, %cst_34 [0] : vector<4x8x32xf32> to vector<8x32xf32>
    %52 = vector.broadcast %41 : vector<1x32xf32> to vector<8x32xf32>
    %53 = arith.addf %51, %52 : vector<8x32xf32>
    %54 = arith.addf %1, %53 : vector<8x32xf32>
    %cst_35 = arith.constant dense<0.000000e+00> : vector<8xf32>
    %55 = vector.multi_reduction <add>, %54, %cst_35 [1] : vector<8x32xf32> to vector<8xf32>
    %56 = vector.shape_cast %55 : vector<8xf32> to vector<8x1xf32>
    %cst_36 = arith.constant 3.200000e+01 : f32
    %57 = vector.broadcast %cst_36 : f32 to vector<8x1xf32>
    %58 = arith.divf %56, %57 : vector<8x1xf32>
    %59 = vector.broadcast %58 : vector<8x1xf32> to vector<8x32xf32>
    %60 = arith.subf %54, %59 : vector<8x32xf32>
    %61 = arith.mulf %60, %60 : vector<8x32xf32>
    %cst_37 = arith.constant dense<0.000000e+00> : vector<8xf32>
    %62 = vector.multi_reduction <add>, %61, %cst_37 [1] : vector<8x32xf32> to vector<8xf32>
    %63 = vector.shape_cast %62 : vector<8xf32> to vector<8x1xf32>
    %cst_38 = arith.constant 3.200000e+01 : f32
    %64 = vector.broadcast %cst_38 : f32 to vector<8x1xf32>
    %65 = arith.divf %63, %64 : vector<8x1xf32>
    %66 = vector.broadcast %58 : vector<8x1xf32> to vector<8x32xf32>
    %67 = arith.subf %54, %66 : vector<8x32xf32>
    %cst_39 = arith.constant 9.99999974E-6 : f32
    %68 = vector.broadcast %cst_39 : f32 to vector<8x1xf32>
    %69 = arith.addf %65, %68 : vector<8x1xf32>
    %70 = math.rsqrt %69 : vector<8x1xf32>
    %71 = vector.broadcast %70 : vector<8x1xf32> to vector<8x32xf32>
    %72 = arith.mulf %67, %71 : vector<8x32xf32>
    %73 = vector.broadcast %42 : vector<1x32xf32> to vector<8x32xf32>
    %74 = arith.mulf %72, %73 : vector<8x32xf32>
    %75 = vector.broadcast %43 : vector<1x32xf32> to vector<8x32xf32>
    %76 = arith.addf %74, %75 : vector<8x32xf32>
    %77 = arith.truncf %76 : vector<8x32xf32> to vector<8x32xbf16>
    %c0_40 = arith.constant 0 : index
    %c0_41 = arith.constant 0 : index
    %78 = vector.load %arg4[%c0_40, %c0_41] : memref<32x128xbf16, #tpu.memory_space<vmem>>, vector<32x128xbf16>
    %cst_42 = arith.constant dense<0.000000e+00> : vector<8x128xf32>
    %79 = tpu.matmul %77, %78, %cst_42 {dimension_numbers = #tpu.dot_dimension_numbers<[1], [0], [0], [1], [0, 0, 1, 1], [], []>} : vector<8x32xbf16>, vector<32x128xbf16>, vector<8x128xf32> -> vector<8x128xf32>
    %80 = vector.broadcast %44 : vector<1x128xf32> to vector<8x128xf32>
    %81 = arith.addf %79, %80 : vector<8x128xf32>
    %cst_43 = arith.constant 0.000000e+00 : f32
    %82 = vector.broadcast %cst_43 : f32 to vector<8x128xf32>
    %83 = arith.maximumf %81, %82 : vector<8x128xf32>
    %84 = arith.truncf %83 : vector<8x128xf32> to vector<8x128xbf16>
    %c0_44 = arith.constant 0 : index
    %c0_45 = arith.constant 0 : index
    %85 = vector.load %arg5[%c0_44, %c0_45] : memref<128x32xbf16, #tpu.memory_space<vmem>>, vector<128x32xbf16>
    %cst_46 = arith.constant dense<0.000000e+00> : vector<8x32xf32>
    %86 = tpu.matmul %84, %85, %cst_46 {dimension_numbers = #tpu.dot_dimension_numbers<[1], [0], [0], [1], [0, 0, 1, 1], [], []>} : vector<8x128xbf16>, vector<128x32xbf16>, vector<8x32xf32> -> vector<8x32xf32>
    %87 = vector.broadcast %45 : vector<1x32xf32> to vector<8x32xf32>
    %88 = arith.addf %86, %87 : vector<8x32xf32>
    %89 = arith.addf %76, %88 : vector<8x32xf32>
    %cst_47 = arith.constant dense<0.000000e+00> : vector<8xf32>
    %90 = vector.multi_reduction <add>, %89, %cst_47 [1] : vector<8x32xf32> to vector<8xf32>
    %91 = vector.shape_cast %90 : vector<8xf32> to vector<8x1xf32>
    %cst_48 = arith.constant 3.200000e+01 : f32
    %92 = vector.broadcast %cst_48 : f32 to vector<8x1xf32>
    %93 = arith.divf %91, %92 : vector<8x1xf32>
    %94 = vector.broadcast %93 : vector<8x1xf32> to vector<8x32xf32>
    %95 = arith.subf %89, %94 : vector<8x32xf32>
    %96 = arith.mulf %95, %95 : vector<8x32xf32>
    %cst_49 = arith.constant dense<0.000000e+00> : vector<8xf32>
    %97 = vector.multi_reduction <add>, %96, %cst_49 [1] : vector<8x32xf32> to vector<8xf32>
    %98 = vector.shape_cast %97 : vector<8xf32> to vector<8x1xf32>
    %cst_50 = arith.constant 3.200000e+01 : f32
    %99 = vector.broadcast %cst_50 : f32 to vector<8x1xf32>
    %100 = arith.divf %98, %99 : vector<8x1xf32>
    %101 = vector.broadcast %93 : vector<8x1xf32> to vector<8x32xf32>
    %102 = arith.subf %89, %101 : vector<8x32xf32>
    %cst_51 = arith.constant 9.99999974E-6 : f32
    %103 = vector.broadcast %cst_51 : f32 to vector<8x1xf32>
    %104 = arith.addf %100, %103 : vector<8x1xf32>
    %105 = math.rsqrt %104 : vector<8x1xf32>
    %106 = vector.broadcast %105 : vector<8x1xf32> to vector<8x32xf32>
    %107 = arith.mulf %102, %106 : vector<8x32xf32>
    %108 = vector.broadcast %46 : vector<1x32xf32> to vector<8x32xf32>
    %109 = arith.mulf %107, %108 : vector<8x32xf32>
    %110 = vector.broadcast %47 : vector<1x32xf32> to vector<8x32xf32>
    %111 = arith.addf %109, %110 : vector<8x32xf32>
    %c0_52 = arith.constant 0 : index
    %c0_53 = arith.constant 0 : index
    %c0_54 = arith.constant 0 : index
    %112 = vector.load %arg7[%c0_52, %c0_53, %c0_54] : memref<1x8x32xf32, #tpu.memory_space<vmem>>, vector<1x8x32xf32>
    %113 = vector.shape_cast %112 : vector<1x8x32xf32> to vector<8x32xf32>
    %114 = vector.shape_cast %111 : vector<8x32xf32> to vector<1x8x32xf32>
    tpu.vector_store %arg7[%c0_52, %c0_53, %c0_54], %114 {strides = array<i32>} : memref<1x8x32xf32, #tpu.memory_space<vmem>>, vector<1x8x32xf32>,
    return
  }
  func.func @transform_0(%arg0: i32) -> (i32, i32, i32) {
    %c0_i32 = arith.constant 0 : i32
    %c0_i32_0 = arith.constant 0 : i32
    %c0_i32_1 = arith.constant 0 : i32
    return %arg0, %c0_i32, %c0_i32_0 : i32, i32, i32
  }
  func.func @transform_1(%arg0: i32) -> (i32, i32, i32, i32) {
    %c0_i32 = arith.constant 0 : i32
    %c0_i32_0 = arith.constant 0 : i32
    %c0_i32_1 = arith.constant 0 : i32
    %c0_i32_2 = arith.constant 0 : i32
    %c0_i32_3 = arith.constant 0 : i32
    return %c0_i32, %c0_i32_0, %c0_i32_1, %c0_i32_2 : i32, i32, i32, i32
  }
  func.func @transform_2(%arg0: i32) -> (i32, i32, i32) {
    %c0_i32 = arith.constant 0 : i32
    %c0_i32_0 = arith.constant 0 : i32
    %c0_i32_1 = arith.constant 0 : i32
    %c0_i32_2 = arith.constant 0 : i32
    return %c0_i32, %c0_i32_0, %c0_i32_1 : i32, i32, i32
  }
  func.func @transform_3(%arg0: i32) -> (i32, i32) {
    %c0_i32 = arith.constant 0 : i32
    %c0_i32_0 = arith.constant 0 : i32
    %c0_i32_1 = arith.constant 0 : i32
    return %c0_i32, %c0_i32_0 : i32, i32
  }
  func.func @transform_4(%arg0: i32) -> (i32, i32) {
    %c0_i32 = arith.constant 0 : i32
    %c0_i32_0 = arith.constant 0 : i32
    %c0_i32_1 = arith.constant 0 : i32
    return %c0_i32, %c0_i32_0 : i32, i32
  }
  func.func @transform_5(%arg0: i32) -> (i32, i32) {
    %c0_i32 = arith.constant 0 : i32
    %c0_i32_0 = arith.constant 0 : i32
    %c0_i32_1 = arith.constant 0 : i32
    return %c0_i32, %c0_i32_0 : i32, i32
  }
  func.func @transform_6(%arg0: i32) -> (i32, i32, i32) {
    %c0_i32 = arith.constant 0 : i32
    %c0_i32_0 = arith.constant 0 : i32
    %c0_i32_1 = arith.constant 0 : i32
    return %arg0, %c0_i32, %c0_i32_0 : i32, i32, i32
  }
}

</mosaic_0001>

<bundles_post_ra>
// kernel: tpu_custom_call.1
= control target key start
LH: loop header
LB: loop body
LE: loop exit
PB: predicated region body
PF: predicated region fallthrough
CT: control target
= control target key end

     0   :  { %11 = vsyncpa [#allocation3], 0  ;;  %s2876_s0 = inlined_call_operand.vmem [shape: f32[2,8,32], index: 0, kind: input, shape index: {}]   ;;  %s2877_s1 = inlined_call_operand.vmem [shape: bf16[3,4,32,8], index: 1, kind: input, shape index: {}]   ;;  %s2878_s2 = inlined_call_operand.vmem [shape: bf16[4,8,32], index: 2, kind: input, shape index: {}]   ;;  %s2879_s3 = inlined_call_operand.vmem [shape: bf16[32,128], index: 3, kind: input, shape index: {}]   ;;  %s2880_s4 = inlined_call_operand.vmem [shape: bf16[128,32], index: 4, kind: input, shape index: {}]   ;;  %s2881_s5 = inlined_call_operand.vmem [shape: f32[8,128], index: 5, kind: input, shape index: {}]   ;;  %s2882_s6 = inlined_call_operand.hbm [shape: f32[2,8,32], index: 6, kind: output, shape index: {}]  }
   0x1   :  { %13 = vsyncpa [#allocation3 + $0x1], 0  ;;  %s2454_s21 = smov 0   ;;  %s2456_s22 = smov 0  }
   0x2   :  { %s2458_s23 = smov 0   ;;  %s2460_s24 = smov 0  }
   0x3 LB: > { %s2475_s25 = sadd.s32 4294967295, %s2414_s24   ;;  %s1881_s26 = sadd.s32 4294967294, %s2414_s24   ;;  %s2414_s24 = sphi %s2460_s24, %s2888_s24   ;;  %s2410_s23 = sphi %s2458_s23, %s2887_s23   ;;  %s2406_s22 = sphi %s2456_s22, %s2886_s22   ;;  %s2402_s21 = sphi %s2454_s21, %s2885_s21  }
   0x4   : > { %s2479_s27 = sadd.s32 1, %s2414_s24   ;;  %s157_s28 = sadd.s32 1, %s2410_s23 }
   0x5   : > { %s154_s29 = ssub.s32 %s2414_s24, %s2479_s27  ;;  %p167_p0 = scmp.ne.s32.totalorder %s2410_s23, %s2406_s22 }
   0x6   : > { %p155_p1 = scmp.eq.s32.totalorder %s154_s29, 0  ;;  %p168_p2 = scmp.eq.s32.totalorder %s2475_s25, 1 }
   0x7   : > { %p173_p3 = scmp.ne.s32.totalorder %s2406_s22, %s2402_s21  ;;  %p174_p4 = scmp.eq.s32.totalorder %s1881_s26, 1 }
   0x8   : > { %s2490_s30 = scalar_select %p155_p1, %s2410_s23, %s157_s28  }
   0x9   : > { %p2492_p5 = por %p168_p2, %p167_p0  ;;  %p2496_p6 = por %p174_p4, %p173_p3 }
   0xa   : > { %p1884_p7 = scmp.ge.s32.totalorder %s2414_s24, 1  ;;  %p214_p8 = scmp.lt.s32.totalorder %s2414_s24, 3 }
   0xc   : > { %p215_p9 = pnand %p1884_p7, %p214_p8 }
   0xd   : > { %v2298_v0 = vld [vmem:[%s2877_s1] sm:$0xff] (!%p215_p9)   ;;  %v2416_v1 = vmov (!%p215_p9), 0.0   ;;  %v2299_v2 = vld [vmem:[%s2877_s1 + $0x30] sm:$0xff] (!%p215_p9)   ;;  %v2300_v3 = vld [vmem:[%s2877_s1 + $0x8] sm:$0xff] (!%p215_p9)   ;;  %vm2417_vm0 = vmmov (!%p215_p9), 0   ;;  %p243_p10 = scmp.lt.s32.totalorder (!%p215_p9), %s2475_s25, 1 }
   0xe   : > { %218 = sbr.rel (%p215_p9) target bundleno = 2326 (0x916), region = 44  ;;  %2061 = vmatprep.subr.bf16.mxu0 (!%p215_p9), %v2416_v1  ;;  %2085 = vmatprep.subr.bf16.mxu1 (!%p215_p9), %v2416_v1  ;;  %v2301_v4 = vld [vmem:[%s2877_s1 + $0x38] sm:$0xff] (!%p215_p9)   ;;  %v2302_v5 = vld [vmem:[%s2877_s1 + $0x10] sm:$0xff] (!%p215_p9)   ;;  %vm278_vm1 = vcmask (!%p215_p9), 261120   ;;  %v2306_v11 = vld [vmem:[%s2877_s1 + $0x20] sm:$0xff] (!%p215_p9)   ;;  %vm940_vm2 = vcmask (!%p215_p9), 64512  }
   0xf   : > { %2062 = vmatpush3.bf16.msra.mxu0 (!%p215_p9), %v2298_v0  ;;  %2065 = vmatprep.mubr.msk.bf16.mxu0 (!%p215_p9), %vm2417_vm0, %v2416_v1  ;;  %v2303_v6 = vld [vmem:[%s2877_s1 + $0x50] sm:$0xff] (!%p215_p9)   ;;  %v2304_v9 = vld [vmem:[%s2877_s1 + $0x18] sm:$0xff] (!%p215_p9)   ;;  %v2308_v13 = vld [vmem:[%s2877_s1 + $0x28] sm:$0xff] (!%p215_p9)   ;;  %vm1191_vm3 = vcmask (!%p215_p9), 1043456   ;;  %s240_s10 = sand.u32 (!%p215_p9), 1, %s2406_s22   ;;  %s1986_s16 = sshll.u32 (!%p215_p9), %s2475_s25, 7 }
  0x10   : > { %2086 = vmatpush3.bf16.msra.mxu1 (!%p215_p9), %v2299_v2  ;;  %2063 = vmatprep.subr.bf16.mxu0 (!%p215_p9), %v2416_v1  ;;  %v2305_v10 = vld [vmem:[%s2877_s1 + $0x58] sm:$0xff] (!%p215_p9)   ;;  %v2307_v12 = vld [vmem:[%s2877_s1 + $0x70] sm:$0xff] (!%p215_p9)   ;;  %v2310_v15 = vld [vmem:[%s2877_s1 + $0x40] sm:$0xff] (!%p215_p9)   ;;  %s1885_s11 = sshll.u32 (!%p215_p9), %s240_s10, 3  ;;  %s2833_s26 = scalar_lea.hbm (!%p215_p9), %s2882_s6, %s1986_s16 }
  0x11   : > { %2087 = vmatprep.subr.bf16.mxu1 (!%p215_p9), %v2416_v1  ;;  %2089 = vmatprep.mubr.msk.bf16.mxu1 (!%p215_p9), %vm2417_vm0, %v2416_v1  ;;  %v2309_v14 = vld [vmem:[%s2877_s1 + $0x78] sm:$0xff] (!%p215_p9)   ;;  %v2314_v16 = vld [vmem:[%s2877_s1 + $0x90] sm:$0xff] (!%p215_p9)   ;;  %v2311_v17 = vld [vmem:[%s2877_s1 + $0x48] sm:$0xff] (!%p215_p9)   ;;  %s1809_s28 = scalar_lea.sflag (!%p215_p9), [#allocation3], %s240_s10 }
  0x12   : > { %v2315_v18 = vld [vmem:[%s2877_s1 + $0x98] sm:$0xff] (!%p215_p9)   ;;  %v2312_v19 = vld [vmem:[%s2877_s1 + $0x60] sm:$0xff] (!%p215_p9)   ;;  %v2316_v20 = vld [vmem:[%s2877_s1 + $0xb0] sm:$0xff] (!%p215_p9)  }
  0x13   : > { %2064 = vmatpush3.bf16.msra.mxu0 (!%p215_p9), %v2300_v3  ;;  %v2313_v21 = vld [vmem:[%s2877_s1 + $0x68] sm:$0xff] (!%p215_p9)   ;;  %v2317_v22 = vld [vmem:[%s2877_s1 + $0xb8] sm:$0xff] (!%p215_p9)   ;;  %v2318_v23 = vld [vmem:[%s2877_s1 + $0x80] sm:$0xff] (!%p215_p9)  }
  0x14   : > { %2088 = vmatpush3.bf16.msra.mxu1 (!%p215_p9), %v2301_v4  ;;  %2069 = vmatprep.subr.bf16.mxu0 (!%p215_p9), %v2416_v1  ;;  %v2319_v24 = vld [vmem:[%s2877_s1 + $0x88] sm:$0xff] (!%p215_p9)   ;;  %v2320_v25 = vld [vmem:[%s2877_s1 + $0xa0] sm:$0xff] (!%p215_p9)  }
  0x15   : > { %s244_s17 = scalar_select %p243_p10, %s2475_s25, 1  ;;  %2101 = vmatprep.subr.bf16.mxu1 %v2416_v1  ;;  %v2321_v26 = vld [vmem:[%s2877_s1 + $0xa8] sm:$0xff]  }
  0x16   : > { %s2418_s25 = smov [#allocation2]  }
  0x17   : > { %s1886_s18 = sshll.u32 %s244_s17, 3  ;;  %s242_s17 = scalar_lea.vmem [#allocation2], %s1885_s11 }
  0x18   : > { %s246_s29 = scalar_lea.vmem %s2876_s0, %s1886_s18  ;;  %s1822_s18 = sshll.u32 %s242_s17, 4  ;;  %s2835_s18 = int_to_ptr.vmem [resolvable:$true] %s1822_s18 }
  0x19   : > { %v2534_v7 = vld [vmem:[%s246_s29] sm:$0xff]  ;;  %s2352_s29 = scalar_lea.vmem %s2835_s18, 128  ;;  %s2356_s9 = sshll.u32 %s2418_s25, 4  ;;  %s2357_s9 = int_to_ptr.vmem [resolvable:$false] %s2356_s9 }
  0x1a   : > { %v2539_v8 = vpack.c.bf16 %v2534_v7, %v2534_v7  ;;  %p2353_p11 = scmp.ne.s32.totalorder %s2835_s18, %s2352_s29  ;;  %s2358_s11 = scalar_lea.vmem %s2357_s9, 256 }
  0x1b   : > { %p2359_p0 = scmp.lt.s32.totalorder %s2835_s18, %s2357_s9  ;;  %p2360_p1 = scmp.lt.s32.totalorder %s2358_s11, %s2352_s29 }
  0x1c   : > { %2066 = vmatmul.mubr.msk.bf16.vlgmr.msra.gmra.mrb[0].mxu0 %vm278_vm1, %v2539_v8  ;;  %2090 = vmatmul.mubr.msk.bf16.vlgmr.msra.gmra.mrb[0].mxu1 %vm278_vm1, %v2539_v8  ;;  %p2354_p12 = pnand %p2353_p11, %p2492_p5 }
  0x1d   : > { %2070 = vmatpush3.bf16.msra.mxu0 %v2302_v5  ;;  %2102 = vmatpush3.bf16.msra.mxu1 %v2303_v6  ;;  %p2361_p2 = por %p2360_p1, %p2359_p0 }
  0x1e   : > { %2071 = vmatprep.subr.bf16.mxu0 %v2416_v1  ;;  %2103 = vmatprep.subr.bf16.mxu1 %v2416_v1  ;;  %p2355_p13 = pneg %p2354_p12 }
  0x1f   : > { %2073 = vmatprep.mubr.msk.bf16.mxu0 %vm2417_vm0, %v2416_v1  ;;  %2105 = vmatprep.mubr.msk.bf16.mxu1 %vm2417_vm0, %v2416_v1 }
  0x20   : > { %p2362_p3 = pnand %p2361_p2, %p2355_p13 }
  0x21   : > { %2072 = vmatpush3.bf16.msra.mxu0 %v2304_v9  ;;  %2104 = vmatpush3.bf16.msra.mxu1 %v2305_v10 }
  0x22   : > { %2077 = vmatprep.subr.bf16.mxu0 %v2416_v1  ;;  %2117 = vmatprep.subr.bf16.mxu1 %v2416_v1 }
  0x24   : > { %2074 = vmatmul.mubr.msk.bf16.vlgmr.msra.gmra.mrb[4].mxu0 %vm278_vm1, %v2539_v8  ;;  %2106 = vmatmul.mubr.msk.bf16.vlgmr.msra.gmra.mrb[4].mxu1 %vm278_vm1, %v2539_v8 }
  0x25   : > { %2078 = vmatpush3.bf16.msra.mxu0 %v2306_v11  ;;  %2118 = vmatpush3.bf16.msra.mxu1 %v2307_v12 }
  0x26   : > { %2079 = vmatprep.subr.bf16.mxu0 %v2416_v1  ;;  %2119 = vmatprep.subr.bf16.mxu1 %v2416_v1 }
  0x27   : > { %2081 = vmatprep.mubr.msk.bf16.mxu0 %vm2417_vm0, %v2416_v1  ;;  %2121 = vmatprep.mubr.msk.bf16.mxu1 %vm2417_vm0, %v2416_v1 }
  0x29   : > { %2080 = vmatpush3.bf16.msra.mxu0 %v2308_v13  ;;  %2120 = vmatpush3.bf16.msra.mxu1 %v2309_v14 }
  0x2a   : > { %2093 = vmatprep.subr.bf16.mxu0 %v2416_v1  ;;  %2133 = vmatprep.subr.bf16.mxu1 %v2416_v1 }
  0x2c   : > { %2082 = vmatmul.mubr.msk.bf16.vlgmr.msra.gmra.mrb[8].mxu0 %vm278_vm1, %v2539_v8  ;;  %2122 = vmatmul.mubr.msk.bf16.vlgmr.msra.gmra.mrb[8].mxu1 %vm278_vm1, %v2539_v8 }
  0x2d   : > { %2094 = vmatpush3.bf16.msra.mxu0 %v2310_v15  ;;  %2097 = vmatprep.mubr.msk.bf16.mxu0 %vm2417_vm0, %v2416_v1 }
  0x2e   : > { %2095 = vmatprep.subr.bf16.mxu0 %v2416_v1  ;;  %2134 = vmatpush3.bf16.msra.mxu1 %v2314_v16 }
  0x2f   : > { %2135 = vmatprep.subr.bf16.mxu1 %v2416_v1  ;;  %2137 = vmatprep.mubr.msk.bf16.mxu1 %vm2417_vm0, %v2416_v1 }
  0x31   : > { %2096 = vmatpush3.bf16.msra.mxu0 %v2311_v17 }
  0x32   : > { %2109 = vmatprep.subr.bf16.mxu0 %v2416_v1  ;;  %2136 = vmatpush3.bf16.msra.mxu1 %v2315_v18 }
  0x33   : > { %2149 = vmatprep.subr.bf16.mxu1 %v2416_v1 }
  0x34   : > { %2098 = vmatmul.mubr.msk.bf16.vlgmr.msra.gmra.mrb[12].mxu0 %vm278_vm1, %v2539_v8 }
  0x35   : > { %2110 = vmatpush3.bf16.msra.mxu0 %v2312_v19  ;;  %2113 = vmatprep.mubr.msk.bf16.mxu0 %vm2417_vm0, %v2416_v1 }
  0x36   : > { %2111 = vmatprep.subr.bf16.mxu0 %v2416_v1  ;;  %2138 = vmatmul.mubr.msk.bf16.vlgmr.msra.gmra.mrb[12].mxu1 %vm278_vm1, %v2539_v8 }
  0x37   : > { %2150 = vmatpush3.bf16.msra.mxu1 %v2316_v20  ;;  %2153 = vmatprep.mubr.msk.bf16.mxu1 %vm2417_vm0, %v2416_v1 }
  0x38   : > { %2151 = vmatprep.subr.bf16.mxu1 %v2416_v1 }
  0x39   : > { %2112 = vmatpush3.bf16.msra.mxu0 %v2313_v21 }
  0x3a   : > { %2125 = vmatprep.subr.bf16.mxu0 %v2416_v1 }
  0x3b   : > { %2152 = vmatpush3.bf16.msra.mxu1 %v2317_v22 }
  0x3c   : > { %2114 = vmatmul.mubr.msk.bf16.vlgmr.msra.gmra.mrb[16].mxu0 %vm278_vm1, %v2539_v8  ;;  %2163 = vmatprep.subr.bf16.mxu1 %v2416_v1 }
  0x3d   : > { %2129 = vmatprep.mubr.msk.bf16.mxu0 %vm2417_vm0, %v2416_v1  ;;  %2126 = vmatpush3.bf16.msra.mxu0 %v2318_v23 }
  0x3e   : > { %2127 = vmatprep.subr.bf16.mxu0 %v2416_v1  ;;  %2154 = vmatmul.mubr.msk.bf16.vlgmr.msra.gmra.mrb[16].mxu1 %vm278_vm1, %v2539_v8 }
  0x3f   : > { %2165 = vmatprep.mubr.msk.bf16.mxu1 %vm2417_vm0, %v2416_v1 }
  0x41   : > { %2128 = vmatpush3.bf16.msra.mxu0 %v2319_v24 }
  0x42   : > { %2141 = vmatprep.subr.bf16.mxu0 %v2416_v1 }
  0x44   : > { %2130 = vmatmul.mubr.msk.bf16.vlgmr.msra.gmra.mrb[20].mxu0 %vm278_vm1, %v2539_v8 }
  0x45   : > { %2145 = vmatprep.mubr.msk.bf16.mxu0 %vm2417_vm0, %v2416_v1  ;;  %2142 = vmatpush3.bf16.msra.mxu0 %v2320_v25 }
  0x46   : > { %2143 = vmatprep.subr.bf16.mxu0 %v2416_v1 }
  0x49   : > { %2144 = vmatpush3.bf16.msra.mxu0 %v2321_v26 }
  0x4a   : > { %2157 = vmatprep.subr.bf16.mxu0 %v2416_v1 }
  0x4c   : > { %2146 = vmatmul.mubr.msk.bf16.vlgmr.msra.gmra.mrb[24].mxu0 %vm278_vm1, %v2539_v8 }
  0x4d   : > { %2159 = vmatprep.mubr.msk.bf16.mxu0 %vm2417_vm0, %v2416_v1 }
  0xef   : > { %v2663_v27 = vpop.f32.mrb[0].mxu0  ;;  %v472_v28 = vpop.f32.mrb[0].mxu1 }
  0xf0   : > { %v2067_v29 = vpop.f32.mrb[1].mxu0  ;;  %v2091_v30 = vpop.f32.mrb[1].mxu1  ;;  %v481_v57 = vpack.c.bf16 %v472_v28, %v472_v28  ;;  %v478_v8 = vpack.c.bf16 %v2663_v27, %v2663_v27 }
  0xf1   : > { %v319_v31 = vpop.f32.mrb[2].mxu0  ;;  %v475_v32 = vpop.f32.mrb[2].mxu1 }
  0xf2   : > { %v2068_v33 = vpop.f32.mrb[3].mxu0  ;;  %v2092_v34 = vpop.f32.mrb[3].mxu1 }
  0xf7   : > { %v368_v35 = vpop.f32.mrb[4].mxu0  ;;  %v597_v36 = vpop.f32.mrb[4].mxu1 }
  0xf8   : > { %v708_v37 = vpack.c.bf16 %v597_v36, %v597_v36  ;;  %v2075_v38 = vpop.f32.mrb[5].mxu0  ;;  %v2107_v39 = vpop.f32.mrb[5].mxu1  ;;  %v479_v47 = vpack.c.bf16 %v368_v35, %v368_v35  ;;  %v1129_v36 = vlaneseq }
  0xf9   : > { %v371_v40 = vpop.f32.mrb[6].mxu0  ;;  %v600_v41 = vpop.f32.mrb[6].mxu1 }
  0xfa   : > { %v991_v42 = vsel %vm940_vm2, %v708_v37, 0  ;;  %v2076_v43 = vpop.f32.mrb[7].mxu0  ;;  %v2108_v44 = vpop.f32.mrb[7].mxu1  ;;  %v1130_v38 = vshrl.u32 %v1129_v36, 7  ;;  %v1132_v39 = vand.u32 127, %v1129_v36 }
  0xfb   : > { %2164 = vmatpush3.bf16.xpose.msra.mxu1 %v991_v42 }
  0xfc   : > { %2175 = vmatprep.subr.bf16.mxu1 %v2416_v1  ;;  %vm1133_vm4 = vcmp.ge.s32.totalorder %v1130_v38, %v1132_v39 }
  0xff   : > { %v420_v45 = vpop.f32.mrb[8].mxu0  ;;  %v701_v46 = vpop.f32.mrb[8].mxu1 }
 0x100   : > { %v710_v48 = vpack.c.bf16 %v701_v46, %v701_v46  ;;  %v2083_v49 = vpop.f32.mrb[9].mxu0  ;;  %v2123_v50 = vpop.f32.mrb[9].mxu1  ;;  %v480_v14 = vpack.c.bf16 %v420_v45, %v420_v45 }
 0x101   : > { %v423_v51 = vpop.f32.mrb[10].mxu0  ;;  %v704_v52 = vpop.f32.mrb[10].mxu1 }
 0x102   : > { %v1083_v53 = vsel %vm940_vm2, %v710_v48, 0  ;;  %v2084_v54 = vpop.f32.mrb[11].mxu0  ;;  %2166 = vmatmul.mubr.msk.bf16.vlgmr.msra.gmra.mrb[20].mxu1 %vm940_vm2, %v479_v47  ;;  %v2124_v55 = vpop.f32.mrb[11].mxu1 }
 0x103   : > { %2176 = vmatpush3.bf16.xpose.msra.mxu1 %v1083_v53  ;;  %2177 = vmatprep.mubr.msk.bf16.mxu1 %vm2417_vm0, %v2416_v1 }
 0x104   : > { %2187 = vmatprep.subr.bf16.mxu1 %v2416_v1 }
 0x107   : > { %v545_v56 = vpop.f32.mrb[12].mxu0 }
 0x108   : > { %v707_v58 = vpack.c.bf16 %v545_v56, %v545_v56  ;;  %v2099_v59 = vpop.f32.mrb[13].mxu0 }
 0x109   : > { %v548_v60 = vpop.f32.mrb[14].mxu0  ;;  %v826_v61 = vpop.f32.mrb[12].mxu1 }
 0x10a   : > { %v945_v62 = vsel %vm940_vm2, %v707_v58, 0  ;;  %v2100_v63 = vpop.f32.mrb[15].mxu0  ;;  %2178 = vmatmul.mubr.msk.bf16.vlgmr.msra.gmra.mrb[24].mxu1 %vm940_vm2, %v481_v57  ;;  %v937_v0 = vpack.c.bf16 %v826_v61, %v826_v61  ;;  %v2139_v2 = vpop.f32.mrb[13].mxu1 }
 0x10b   : > { %2158 = vmatpush3.bf16.xpose.msra.mxu0 %v945_v62  ;;  %v829_v3 = vpop.f32.mrb[14].mxu1  ;;  %2189 = vmatprep.mubr.msk.bf16.mxu1 %vm2417_vm0, %v2416_v1 }
 0x10c   : > { %2169 = vmatprep.subr.bf16.mxu0 %v2416_v1  ;;  %v1239_v4 = vsel %vm1191_vm3, %v937_v0, 0  ;;  %v2140_v5 = vpop.f32.mrb[15].mxu1 }
 0x10d   : > { %2188 = vmatpush3.bf16.msra.mxu1 %v1239_v4 }
 0x10e   : > { %2199 = vmatprep.subr.bf16.mxu1 %v2416_v1 }
 0x10f   : > { %v649_v6 = vpop.f32.mrb[16].mxu0 }
 0x110   : > { %v709_v9 = vpack.c.bf16 %v649_v6, %v649_v6  ;;  %v2115_v10 = vpop.f32.mrb[17].mxu0 }
 0x111   : > { %v652_v11 = vpop.f32.mrb[18].mxu0  ;;  %v2689_v15 = vpop.f32.mrb[16].mxu1 }
 0x112   : > { %v1037_v12 = vsel %vm940_vm2, %v709_v9, 0  ;;  %v2116_v13 = vpop.f32.mrb[19].mxu0  ;;  %2160 = vmatmul.mubr.msk.bf16.vlgmr.msra.gmra.mrb[28].mxu0 %vm940_vm2, %v478_v8  ;;  %v2155_v16 = vpop.f32.mrb[17].mxu1 }
 0x113   : > { %2170 = vmatpush3.bf16.xpose.msra.mxu0 %v1037_v12  ;;  %2171 = vmatprep.mubr.msk.bf16.mxu0 %vm2417_vm0, %v2416_v1  ;;  %v933_v17 = vpop.f32.mrb[18].mxu1 }
 0x114   : > { %2181 = vmatprep.subr.bf16.mxu0 %v2416_v1  ;;  %v2156_v18 = vpop.f32.mrb[19].mxu1 }
 0x117   : > { %v774_v19 = vpop.f32.mrb[20].mxu0 }
 0x118   : > { %v936_v20 = vpack.c.bf16 %v774_v19, %v774_v19  ;;  %v2131_v21 = vpop.f32.mrb[21].mxu0 }
 0x119   : > { %v777_v22 = vpop.f32.mrb[22].mxu0 }
 0x11a   : > { %2172 = vmatmul.mubr.msk.bf16.vlgmr.msra.gmra.mrb[32].mxu0 %vm940_vm2, %v480_v14  ;;  %v1193_v23 = vsel %vm1191_vm3, %v936_v20, 0  ;;  %v2132_v24 = vpop.f32.mrb[23].mxu0 }
 0x11b   : > { %2183 = vmatprep.mubr.msk.bf16.mxu0 %vm2417_vm0, %v2416_v1  ;;  %2182 = vmatpush3.bf16.msra.mxu0 %v1193_v23 }
 0x11c   : > { %2193 = vmatprep.subr.bf16.mxu0 %v2416_v1 }
 0x11f   : > { %v2693_v25 = vpop.f32.mrb[24].mxu0 }
 0x120   : > { %v2147_v26 = vpop.f32.mrb[25].mxu0  ;;  %v938_v23 = vpack.c.bf16 %v2693_v25, %v2693_v25 }
 0x121   : > { %v881_v27 = vpop.f32.mrb[26].mxu0 }
 0x122   : > { %v2148_v28 = vpop.f32.mrb[27].mxu0 }
 0x1d5   : > { %v1027_v29 = vpop.f32.mrb[20].mxu1 }
 0x1d6   : > { %v2167_v30 = vpop.f32.mrb[21].mxu1  ;;  %v1126_v41 = vmul.f32 0.35355338, %v1027_v29  ;;  %v939_v29 = vpack.c.bf16 %v2689_v15, %v2689_v15 }
 0x1d7   : > { %v1030_v31 = vpop.f32.mrb[22].mxu1  ;;  %v1285_v30 = vsel %vm1191_vm3, %v938_v23, 0  ;;  %v1967_v23 = vld [vmem:[%s2881_s5] ss:$0 sm:$0xff] }
 0x1d8   : > { %v2168_v32 = vpop.f32.mrb[23].mxu1  ;;  %v1137_v48 = vsel %vm1133_vm4, %v1126_v41, -1e+30 }
 0x1d9   : > { %v1143_v50 = vsel %vm940_vm2, %v1137_v48, -inf }
 0x1dd   : > { %v1119_v33 = vpop.f32.mrb[24].mxu1 }
 0x1de   : > { %v2179_v34 = vpop.f32.mrb[25].mxu1  ;;  %v1128_v51 = vmul.f32 0.35355338, %v1119_v33  ;;  %v1384_v33 = vld [vmem:[%s2878_s2] sm:$0xf] }
 0x1df   : > { %v1122_v35 = vpop.f32.mrb[26].mxu1  ;;  %v1331_v34 = vsel %vm1191_vm3, %v939_v29, 0  ;;  %v1392_v36 = vsel %vm1191_vm3, %v1384_v33, 0 }
 0x1e0   : > { %v2180_v37 = vpop.f32.mrb[27].mxu1  ;;  %v1139_v58 = vsel %vm1133_vm4, %v1128_v51, -1e+30 }
 0x1e1   : > { %v1149_v59 = vsel %vm940_vm2, %v1139_v58, -inf }
 0x1e5   : > { %v981_v40 = vpop.f32.mrb[28].mxu0 }
 0x1e6   : > { %v1125_v42 = vmul.f32 0.35355338, %v981_v40  ;;  %v2161_v43 = vpop.f32.mrb[29].mxu0  ;;  %v1385_v40 = vld [vmem:[%s2878_s2 + $0x4] sm:$0xf] }
 0x1e7   : > { %v984_v44 = vpop.f32.mrb[30].mxu0  ;;  %v1438_v41 = vsel %vm1191_vm3, %v1385_v40, 0  ;;  %v2327_v40 = vld [vmem:[%s2880_s4 + $0x18] sm:$0xff]  }
 0x1e8   : > { %v2162_v45 = vpop.f32.mrb[31].mxu0  ;;  %v1136_v46 = vsel %vm1133_vm4, %v1125_v42, -1e+30  ;;  %v1386_v42 = vld [vmem:[%s2878_s2 + $0x8] sm:$0xf] }
 0x1e9   : > { %v1140_v47 = vsel %vm940_vm2, %v1136_v46, -inf }
 0x1ea   : > { %1141 = vmax.xlane.f32.xlu0 %v1140_v47 }
 0x1ed   : > { %v1073_v49 = vpop.f32.mrb[32].mxu0 }
 0x1ee   : > { %v1127_v52 = vmul.f32 0.35355338, %v1073_v49  ;;  %1144 = vmax.xlane.f32.xlu0 %v1143_v50  ;;  %v2173_v53 = vpop.f32.mrb[33].mxu0 }
 0x1ef   : > { %v1076_v54 = vpop.f32.mrb[34].mxu0 }
 0x1f0   : > { %v2174_v55 = vpop.f32.mrb[35].mxu0  ;;  %v1138_v56 = vsel %vm1133_vm4, %v1127_v52, -1e+30 }
 0x1f1   : > { %v1146_v57 = vsel %vm940_vm2, %v1138_v56, -inf }
 0x1f2   : > { %1147 = vmax.xlane.f32.xlu1 %v1146_v57 }
 0x1f6   : > { %1150 = vmax.xlane.f32.xlu1 %v1149_v59 }
 0x277   : > { %v1142_v60 = vpop.xlane.xlu0 %1141 }
 0x278   : > { %v1152_v61 = vsub.f32 %v1136_v46, %v1142_v60  ;;  %v1484_v46 = vsel %vm1191_vm3, %v1386_v42, 0  ;;  %v2329_v42 = vld [vmem:[%s2880_s4 + $0x28] sm:$0xff]  }
 0x27a   : > { %v1156_v62 = vmul.f32 1.442695, %v1152_v61 }
 0x27b   : > { %v1145_v63 = vpop.xlane.xlu0 %1144 }
 0x27c   : > { %2332 = vpow2.f32 %v1156_v62  ;;  %v1153_v0 = vsub.f32 %v1137_v48, %v1145_v63  ;;  %v1387_v48 = vld [vmem:[%s2878_s2 + $0xc] sm:$0xf] }
 0x27d   : > { %v1530_v53 = vsel %vm1191_vm3, %v1387_v48, 0 }
 0x27e   : > { %v1158_v2 = vmul.f32 1.442695, %v1153_v0 }
 0x27f   : > { %v1148_v3 = vpop.xlane.xlu1 %1147 }
 0x280   : > { %2334 = vpow2.f32 %v1158_v2  ;;  %v1154_v4 = vsub.f32 %v1138_v56, %v1148_v3 }
 0x282   : > { %v1160_v5 = vmul.f32 1.442695, %v1154_v4 }
 0x283   : > { %v1151_v6 = vpop.xlane.xlu1 %1150 }
 0x284   : > { %2336 = vpow2.f32 %v1160_v5  ;;  %v1155_v8 = vsub.f32 %v1139_v58, %v1151_v6 }
 0x286   : > { %v2333_v9 = vpop.eup %2332  ;;  %v1162_v10 = vmul.f32 1.442695, %v1155_v8 }
 0x287   : > { %v1164_v11 = vsel %vm940_vm2, %v2333_v9, 0.0 }
 0x288   : > { %2338 = vpow2.f32 %v1162_v10  ;;  %1165 = vadd.xlane.f32.xlu0 %v1164_v11 }
 0x28a   : > { %v2335_v12 = vpop.eup %2334 }
 0x28b   : > { %v1167_v13 = vsel %vm940_vm2, %v2335_v12, 0.0 }
 0x28c   : > { %1168 = vadd.xlane.f32.xlu1 %v1167_v13 }
 0x28e   : > { %v2337_v14 = vpop.eup %2336 }
 0x28f   : > { %v1170_v16 = vsel %vm940_vm2, %v2337_v14, 0.0 }
 0x290   : > { %1171 = vadd.xlane.f32.xlu0 %v1170_v16 }
 0x292   : > { %v2339_v17 = vpop.eup %2338 }
 0x293   : > { %v1173_v18 = vsel %vm940_vm2, %v2339_v17, 0.0 }
 0x294   : > { %1174 = vadd.xlane.f32.xlu1 %v1173_v18 }
 0x315   : > { %v1166_v19 = vpop.xlane.xlu0 %1165 }
 0x316   : > { %2340 = vrcp.f32 %v1166_v19 }
 0x319   : > { %v1169_v20 = vpop.xlane.xlu1 %1168 }
 0x31a   : > { %2342 = vrcp.f32 %v1169_v20 }
 0x31d   : > { %v1172_v21 = vpop.xlane.xlu0 %1171 }
 0x31e   : > { %2344 = vrcp.f32 %v1172_v21 }
 0x320   : > { %v2341_v22 = vpop.eup %2340 }
 0x321   : > { %v1180_v24 = vmul.f32 %v2341_v22, %v2333_v9  ;;  %v1175_v26 = vpop.xlane.xlu1 %1174 }
 0x322   : > { %2346 = vrcp.f32 %v1175_v26 }
 0x323   : > { %v1184_v27 = vpack.c.bf16 %v1180_v24, %v1180_v24 }
 0x324   : > { %v2343_v28 = vpop.eup %2342 }
 0x325   : > { %v1181_v31 = vmul.f32 %v2343_v28, %v2335_v12  ;;  %2184 = vmatmul.mubr.msk.bf16.vlgmr.msra.gmra.mrb[36].mxu0 %vm940_vm2, %v1184_v27 }
 0x326   : > { %2194 = vmatpush3.bf16.msra.mxu0 %v1285_v30  ;;  %2195 = vmatprep.mubr.msk.bf16.mxu0 %vm2417_vm0, %v2416_v1 }
 0x327   : > { %v1185_v32 = vpack.c.bf16 %v1181_v31, %v1181_v31  ;;  %2205 = vmatprep.subr.bf16.mxu0 %v2416_v1 }
 0x328   : > { %v2345_v25 = vpop.eup %2344 }
 0x329   : > { %v1182_v15 = vmul.f32 %v2345_v25, %v2337_v14  ;;  %2190 = vmatmul.mubr.msk.bf16.vlgmr.msra.gmra.mrb[28].mxu1 %vm940_vm2, %v1185_v32 }
 0x32a   : > { %2200 = vmatpush3.bf16.msra.mxu1 %v1331_v34  ;;  %2201 = vmatprep.mubr.msk.bf16.mxu1 %vm2417_vm0, %v2416_v1 }
 0x32b   : > { %v1186_v35 = vpack.c.bf16 %v1182_v15, %v1182_v15  ;;  %2211 = vmatprep.subr.bf16.mxu1 %v2416_v1 }
 0x32c   : > { %v2347_v37 = vpop.eup %2346 }
 0x32d   : > { %v1183_v38 = vmul.f32 %v2347_v37, %v2339_v17  ;;  %2196 = vmatmul.mubr.msk.bf16.vlgmr.msra.gmra.mrb[40].mxu0 %vm940_vm2, %v1186_v35  ;;  %v2323_v37 = vld [vmem:[%s2879_s3 + $0x8] sm:$0xff]  }
 0x32e   : > { %2206 = vmatpush3.bf16.msra.mxu0 %v1392_v36  ;;  %2207 = vmatprep.mubr.msk.bf16.mxu0 %vm2417_vm0, %v2416_v1  ;;  %v2322_v36 = vld [vmem:[%s2879_s3] sm:$0xff]  }
 0x32f   : > { %v1187_v39 = vpack.c.bf16 %v1183_v38, %v1183_v38  ;;  %2217 = vmatprep.subr.bf16.mxu0 %v2416_v1  ;;  %v2325_v38 = vld [vmem:[%s2880_s4 + $0x8] sm:$0xff]  }
 0x331   : > { %2202 = vmatmul.mubr.msk.bf16.vlgmr.msra.gmra.mrb[32].mxu1 %vm940_vm2, %v1187_v39  ;;  %v2326_v39 = vld [vmem:[%s2880_s4 + $0x10] sm:$0xff]  }
 0x332   : > { %2213 = vmatprep.mubr.msk.bf16.mxu1 %vm2417_vm0, %v2416_v1  ;;  %2212 = vmatpush3.bf16.msra.mxu1 %v1438_v41  ;;  %v2328_v41 = vld [vmem:[%s2880_s4 + $0x20] sm:$0xff]  }
 0x333   : > { %2223 = vmatprep.subr.bf16.mxu1 %v2416_v1 }
 0x3f8   : > { %v1229_v43 = vpop.f32.mrb[36].mxu0 }
 0x3f9   : > { %v1380_v44 = vpack.c.bf16 %v1229_v43, %v1229_v43  ;;  %v2185_v45 = vpop.f32.mrb[37].mxu0 }
 0x3fa   : > { %v1232_v47 = vpop.f32.mrb[38].mxu0 }
 0x3fb   : > { %v2186_v49 = vpop.f32.mrb[39].mxu0  ;;  %2208 = vmatmul.mubr.msk.bf16.vlgmr.msra.gmra.mrb[44].mxu0 %vm940_vm2, %v1380_v44  ;;  %v1968_v47 = vld [vmem:[%s2881_s5 + $0x1] ss:$0 sm:$0xff] }
 0x3fc   : > { %v1275_v50 = vpop.f32.mrb[28].mxu1  ;;  %2218 = vmatpush3.bf16.msra.mxu0 %v1484_v46  ;;  %2219 = vmatprep.mubr.msk.bf16.mxu0 %vm2417_vm0, %v2416_v1  ;;  %v1969_v49 = vld [vmem:[%s2881_s5 + $0x2] ss:$0 sm:$0xff] }
 0x3fd   : > { %v1381_v51 = vpack.c.bf16 %v1275_v50, %v1275_v50  ;;  %v2191_v52 = vpop.f32.mrb[29].mxu1  ;;  %2229 = vmatprep.subr.bf16.mxu0 %v2416_v1 }
 0x3fe   : > { %v1278_v54 = vpop.f32.mrb[30].mxu1 }
 0x3ff   : > { %v2192_v55 = vpop.f32.mrb[31].mxu1  ;;  %2214 = vmatmul.mubr.msk.bf16.vlgmr.msra.gmra.mrb[36].mxu1 %vm940_vm2, %v1381_v51  ;;  %v2331_v54 = vld [vmem:[%s2880_s4 + $0x38] sm:$0xff]  }
 0x400   : > { %v1321_v56 = vpop.f32.mrb[40].mxu0  ;;  %2224 = vmatpush3.bf16.msra.mxu1 %v1530_v53  ;;  %2225 = vmatprep.mubr.msk.bf16.mxu1 %vm2417_vm0, %v2416_v1  ;;  %v2330_v53 = vld [vmem:[%s2880_s4 + $0x30] sm:$0xff]   ;;  %v1970_v55 = vld [vmem:[%s2881_s5 + $0x3] ss:$0 sm:$0xff] }
 0x401   : > { %v1382_v57 = vpack.c.bf16 %v1321_v56, %v1321_v56  ;;  %v2197_v58 = vpop.f32.mrb[41].mxu0  ;;  %2237 = vmatprep.subr.bf16.mxu1 %v2416_v1 }
 0x402   : > { %v1324_v59 = vpop.f32.mrb[42].mxu0 }
 0x403   : > { %v2198_v60 = vpop.f32.mrb[43].mxu0  ;;  %2220 = vmatmul.mubr.msk.bf16.vlgmr.msra.gmra.mrb[48].mxu0 %vm940_vm2, %v1382_v57 }
 0x404   : > { %v1367_v61 = vpop.f32.mrb[32].mxu1  ;;  %2233 = vmatprep.mubr.msk.bf16.mxu0 %vm2417_vm0, %v2416_v1  ;;  %2230 = vmatpush3.bf16.msra.mxu0 %v2322_v36 }
 0x405   : > { %v1383_v62 = vpack.c.bf16 %v1367_v61, %v1367_v61  ;;  %v2203_v63 = vpop.f32.mrb[33].mxu1  ;;  %2231 = vmatprep.subr.bf16.mxu0 %v2416_v1 }
 0x406   : > { %v1370_v0 = vpop.f32.mrb[34].mxu1 }
 0x407   : > { %v2204_v2 = vpop.f32.mrb[35].mxu1  ;;  %2226 = vmatmul.mubr.msk.bf16.vlgmr.msra.gmra.mrb[40].mxu1 %vm940_vm2, %v1383_v62 }
 0x408   : > { %2253 = vmatprep.mubr.msk.bf16.mxu1 %vm2417_vm0, %v2416_v1  ;;  %2232 = vmatpush3.bf16.msra.mxu0 %v2323_v37 }
 0x4ce   : > { %v1428_v3 = vpop.f32.mrb[44].mxu0 }
 0x4cf   : > { %v2209_v4 = vpop.f32.mrb[45].mxu0  ;;  %v1572_v9 = vsel %vm278_vm1, %v1428_v3, 0.0 }
 0x4d0   : > { %v1431_v5 = vpop.f32.mrb[46].mxu0 }
 0x4d1   : > { %v2210_v6 = vpop.f32.mrb[47].mxu0 }
 0x4d2   : > { %v1474_v8 = vpop.f32.mrb[36].mxu1 }
 0x4d3   : > { %v1573_v10 = vsel %vm278_vm1, %v1474_v8, 0.0  ;;  %v2215_v11 = vpop.f32.mrb[37].mxu1 }
 0x4d4   : > { %v1574_v12 = vadd.f32 %v1573_v10, %v1572_v9  ;;  %v1477_v13 = vpop.f32.mrb[38].mxu1 }
 0x4d5   : > { %v2216_v14 = vpop.f32.mrb[39].mxu1 }
 0x4d6   : > { %v1520_v16 = vpop.f32.mrb[48].mxu0 }
 0x4d7   : > { %v1575_v17 = vsel %vm278_vm1, %v1520_v16, 0.0  ;;  %v2221_v18 = vpop.f32.mrb[49].mxu0 }
 0x4d8   : > { %v1576_v19 = vadd.f32 %v1575_v17, %v1574_v12  ;;  %v1523_v20 = vpop.f32.mrb[50].mxu0  ;;  %v1983_v18 = vld [vmem:[%s2881_s5 + $0x5] ss:$0 sm:$0xff] }
 0x4d9   : > { %v2222_v21 = vpop.f32.mrb[51].mxu0  ;;  %v1984_v20 = vld [vmem:[%s2881_s5 + $0x6] ss:$0 sm:$0xff] }
 0x4da   : > { %v1566_v22 = vpop.f32.mrb[40].mxu1 }
 0x4db   : > { %v1577_v24 = vsel %vm278_vm1, %v1566_v22, 0.0  ;;  %v2227_v26 = vpop.f32.mrb[41].mxu1 }
 0x4dc   : > { %v1578_v27 = vadd.f32 %v1577_v24, %v1576_v19  ;;  %v1569_v28 = vpop.f32.mrb[42].mxu1 }
 0x4dd   : > { %v2228_v29 = vpop.f32.mrb[43].mxu1 }
 0x4de   : > { %v1583_v30 = vadd.f32 %v1967_v23, %v1578_v27 }
 0x4e0   : > { %v1584_v31 = vadd.f32 %v1583_v30, %v2534_v7  ;;  %v2324_v7 = vld [vmem:[%s2880_s4] sm:$0xff]  }
 0x4e1   : > { %2238 = vmatpush3.bf16.msra.mxu1 %v2324_v7 }
 0x4e2   : > { %v1585_v32 = vsel %vm278_vm1, %v1584_v31, 0.0  ;;  %2239 = vmatprep.subr.bf16.mxu1 %v2416_v1 }
 0x4e3   : > { %1586 = vadd.xlane.f32.xlu0 %v1585_v32 }
 0x4e5   : > { %2240 = vmatpush3.bf16.msra.mxu1 %v2325_v38 }
 0x4e6   : > { %2241 = vmatprep.subr.bf16.mxu1 %v2416_v1 }
 0x4e9   : > { %2242 = vmatpush3.bf16.msra.mxu1 %v2326_v39 }
 0x4ea   : > { %2243 = vmatprep.subr.bf16.mxu1 %v2416_v1 }
 0x4ed   : > { %2244 = vmatpush3.bf16.msra.mxu1 %v2327_v40 }
 0x4ee   : > { %2245 = vmatprep.subr.bf16.mxu1 %v2416_v1 }
 0x4f1   : > { %2246 = vmatpush3.bf16.msra.mxu1 %v2328_v41 }
 0x4f2   : > { %2247 = vmatprep.subr.bf16.mxu1 %v2416_v1 }
 0x4f5   : > { %2248 = vmatpush3.bf16.msra.mxu1 %v2329_v42 }
 0x4f6   : > { %2249 = vmatprep.subr.bf16.mxu1 %v2416_v1 }
 0x4f9   : > { %2250 = vmatpush3.bf16.msra.mxu1 %v2330_v53 }
 0x4fa   : > { %2251 = vmatprep.subr.bf16.mxu1 %v2416_v1  ;;  %v1974_v1 = vld [vmem:[%s2881_s5 + $0x4] ss:$0 sm:$0xff] }
 0x4fd   : > { %2252 = vmatpush3.bf16.msra.mxu1 %v2331_v54 }
 0x570   : > { %v1587_v25 = vpop.xlane.xlu0 %1586 }
 0x571   : > { %v1589_v33 = vmul.f32 0.03125, %v1587_v25 }
 0x573   : > { %v1590_v34 = vsub.f32 %v1584_v31, %v1589_v33 }
 0x575   : > { %v1591_v15 = vmul.f32 %v1590_v34, %v1590_v34 }
 0x577   : > { %v1592_v35 = vsel %vm278_vm1, %v1591_v15, 0.0 }
 0x578   : > { %1593 = vadd.xlane.f32.xlu1 %v1592_v35 }
 0x605   : > { %v1594_v43 = vpop.xlane.xlu1 %1593 }
 0x606   : > { %v1595_v44 = vmul.f32 0.03125, %v1594_v43 }
 0x608   : > { %v1596_v45 = vadd.f32 1e-05, %v1595_v44 }
 0x60a   : > { %2348 = vrsqrt.f32 %v1596_v45 }
 0x614   : > { %v2349_v46 = vpop.eup %2348 }
 0x615   : > { %v1598_v48 = vmul.f32 %v2349_v46, %v1590_v34 }
 0x617   : > { %v1603_v50 = vmul.f32 %v1968_v47, %v1598_v48 }
 0x619   : > { %v1608_v51 = vadd.f32 %v1969_v49, %v1603_v50 }
 0x61b   : > { %v1609_v52 = vpack.c.bf16 %v1608_v51, %v1608_v51 }
 0x61d   : > { %2234 = vmatmul.mubr.msk.bf16.vlgmr.msra.gmra.mrb[52].mxu0 %vm278_vm1, %v1609_v52 }
 0x6f0   : > { %v1667_v56 = vpop.f32.mrb[52].mxu0 }
 0x6f1   : > { %v1668_v57 = vadd.f32 %v1970_v55, %v1667_v56  ;;  %v2235_v58 = vpop.f32.mrb[53].mxu0 }
 0x6f2   : > { %v1670_v59 = vpop.f32.mrb[54].mxu0 }
 0x6f3   : > { %v1673_v60 = vmax.f32 %v1668_v57, 0.0  ;;  %v2236_v61 = vpop.f32.mrb[55].mxu0 }
 0x6f5   : > { %v1674_v62 = vpack.c.bf16 %v1673_v60, %v1673_v60 }
 0x6f7   : > { %2254 = vmatmul.mubr.bf16.vlgmr.msra.gmra.mrb[44].mxu1 %v1674_v62 }
 0x7ca   : > { %v1777_v63 = vpop.f32.mrb[44].mxu1 }
 0x7cb   : > { %v1778_v0 = vadd.f32 %v1974_v1, %v1777_v63  ;;  %v2255_v2 = vpop.f32.mrb[45].mxu1 }
 0x7cc   : > { %v1780_v3 = vpop.f32.mrb[46].mxu1 }
 0x7cd   : > { %v2256_v4 = vpop.f32.mrb[47].mxu1  ;;  %v1783_v5 = vadd.f32 %v1778_v0, %v1608_v51 }
 0x7cf   : > { %v1784_v6 = vsel %vm278_vm1, %v1783_v5, 0.0 }
 0x7d0   : > { %1785 = vadd.xlane.f32.xlu0 %v1784_v6 }
 0x85d   : > { %v1786_v8 = vpop.xlane.xlu0 %1785 }
 0x85e   : > { %v1787_v9 = vmul.f32 0.03125, %v1786_v8 }
 0x860   : > { %v1788_v10 = vsub.f32 %v1783_v5, %v1787_v9 }
 0x862   : > { %v1789_v11 = vmul.f32 %v1788_v10, %v1788_v10 }
 0x864   : > { %v1790_v12 = vsel %vm278_vm1, %v1789_v11, 0.0 }
 0x865   : > { %1791 = vadd.xlane.f32.xlu1 %v1790_v12 }
 0x8f2   : > { %v1792_v13 = vpop.xlane.xlu1 %1791 }
 0x8f3   : > { %v1793_v14 = vmul.f32 0.03125, %v1792_v13 }
 0x8f5   : > { %v1794_v16 = vadd.f32 1e-05, %v1793_v14 }
 0x8f7   : > { %2350 = vrsqrt.f32 %v1794_v16 }
 0x901   : > { %v2351_v17 = vpop.eup %2350 }
 0x902   : > { %v1796_v19 = vmul.f32 %v2351_v17, %v1788_v10 }
 0x904   : > { %v1801_v21 = vmul.f32 %v1983_v18, %v1796_v19 }
 0x906   : > { %v1806_v22 = vadd.f32 %v1984_v20, %v1801_v21 }
 0x908   : > { %1807 = vst.msk [vmem:[%s242_s17] sm:$0xff] %vm278_vm1, %v1806_v22 }
 0x909   : > { %2365 = shalt.err (!%p2362_p3)
}
 0x90a   : > { %s2366_s10 = scalar_lea.hbm %s2833_s26, 128  ;;  %s2370_s14 = scalar_lea.hbm %s2882_s6, 256 }
 0x90b   : > { %p2367_p4 = scmp.ne.s32.totalorder %s2833_s26, %s2366_s10  ;;  %p2371_p9 = scmp.lt.u32.totalorder %s2833_s26, %s2882_s6 }
 0x90c   : > { %p2372_p10 = scmp.lt.u32.totalorder %s2370_s14, %s2366_s10  ;;  %p2374_p12 = scmp.lt.u32.totalorder %s2366_s10, %s2833_s26 }
 0x90d   : > { %p2368_p7 = pnand %p2367_p4, %p2492_p5 }
 0x90e   : > { %p2373_p11 = por %p2372_p10, %p2371_p9 }
 0x90f   : > { %p2369_p8 = pneg %p2368_p7 }
 0x910   : > { %p2375_p13 = por %p2374_p12, %p2373_p11 }
 0x912   : > { %p2376_p0 = pnand %p2375_p13, %p2369_p8 }
 0x914   : > { %2379 = shalt.err (!%p2376_p0)
}
 0x915   : > { %2257 = dma.vmem_to_hbm [thread:$0]  (%p2492_p5), %s2835_s18, 128, %s2833_s26, %s1809_s28  }
 0x916 PF: > { %p2263_p1 = scmp.ge.s32.totalorder %s2414_s24, 2  ;;  %s1834_s17 = sand.u32 1, %s2402_s21  }
 0x917   : > { %s1835_s19 = scalar_lea.sflag [#allocation3], %s1834_s17 }
 0x918   : > { %p2260_p2 = pnand %p2263_p1, %p2496_p6 }
 0x91a   : > { %2397 = dma.done.wait (!%p2260_p2), %s1835_s19, 128  }
 0x91b   : > { %2399 = vsyncadd (!%p2260_p2), %s1835_s19, 4294967168  ;;  %p16_p3 = scmp.ge.s32.totalorder %s2479_s27, 4   ;;  %s2885_s21 = smov %s2406_s22 }
 0x91c   : > { %s2886_s22 = smov %s2410_s23  ;;  %s2887_s23 = smov %s2490_s30 }
 0x91d   : > { %s2888_s24 = smov %s2479_s27  ;;  %18 = sbr.rel (!%p16_p3) target bundleno = 3 (0x3), region = 81 }
 0x924   :  { %1840 = vsyncpa [#allocation3], 1 }
 0x925   :  { %1842 = vsyncpa [#allocation3 + $0x1], 1 }

</bundles_post_ra>
